<compile_context>
chip_gen: v7x
topology: tpu7x:2x2x1
jax: 0.10.0
libtpu: 0.0.40
codegen_flags: <defaults>
</compile_context>

<pallas_src>
import functools

import jax
import jax.numpy as jnp
from jax.experimental import pallas as pl
from jax.experimental.pallas import tpu as pltpu

LN_EPS = 1e-5  # torch.nn.LayerNorm default


# ----------------------------- Pallas kernel --------------------------------


def _layernorm(x, g, b):
    mu = jnp.mean(x, axis=-1, keepdims=True)
    var = jnp.mean((x - mu) ** 2, axis=-1, keepdims=True)
    return (x - mu) * jax.lax.rsqrt(var + LN_EPS) * g + b


def transformer_layer_kernel(x_ref,
                             ln1_g_ref, ln1_b_ref,
                             wvT_ref, woT_ref, bo_ref,
                             ln2_g_ref, ln2_b_ref,
                             w1T_ref, b1_ref, w2T_ref, b2_ref,
                             out_w_ref, out_b_ref,
                             y_ref,
                             x_acc,
                             *, mm_dtype):
    """One TransformerBlock for one row tile; layers iterate on grid axis 1."""
    l = pl.program_id(1)
    n_layers = pl.num_programs(1)

    # Load the residual stream into the carried VMEM accumulator at layer 0.
    @pl.when(l == 0)
    def _():
        x_acc[...] = x_ref[...].astype(jnp.float32)

    x = x_acc[...]                                           # (tm, E) f32

    # --- x = x + attention(lm1(x)) ---
    # MultiHeadAttention with heads == 1: energy is (.., 1, 1), softmax over the
    # singleton axis is exactly 1.0 => attention @ V == V, and Q/K never affect
    # the output.  The sublayer reduces to fc_out(V) = (h @ Wv^T) @ Wo^T + bo.
    h = _layernorm(x, ln1_g_ref[0], ln1_b_ref[0])
    v = jnp.dot(h.astype(mm_dtype), wvT_ref[0],
                preferred_element_type=jnp.float32)
    attn = jnp.dot(v.astype(mm_dtype), woT_ref[0],
                   preferred_element_type=jnp.float32) + bo_ref[0]
    x = x + attn

    # --- x = x + feed_forward(lm2(x)) ---
    h2 = _layernorm(x, ln2_g_ref[0], ln2_b_ref[0])
    f = jnp.dot(h2.astype(mm_dtype), w1T_ref[0],
                preferred_element_type=jnp.float32) + b1_ref[0]
    f = jnp.maximum(f, 0.0)
    f = jnp.dot(f.astype(mm_dtype), w2T_ref[0],
                preferred_element_type=jnp.float32) + b2_ref[0]
    x = x + f
    x_acc[...] = x

    # --- final Linear(dim, 1): VPU multiply + lane reduction, lane-dense out ---
    @pl.when(l == n_layers - 1)
    def _():
        w_row = out_w_ref[...].astype(jnp.float32)           # (1, E)
        y = jnp.sum(x * w_row, axis=-1).reshape(1, -1)       # (1, tm), lane dense
        y_ref[...] = (y + out_b_ref[...]).astype(y_ref.dtype)


# ----------------------------- Pallas wrapper --------------------------------


def _choose_tiling(n_rows):
    """MXU-aligned row tile (256 fills a v6e/v7x MXU M pass; 128 a v5e pass).
    Falls back to zero-row padding instead of one giant tile."""
    for tm in (256, 128):
        if n_rows >= tm and n_rows % tm == 0:
            return tm, n_rows
    if n_rows >= 256:
        tm = 256
    elif n_rows >= 128:
        tm = 128
    else:
        tm = max(8, ((n_rows + 7) // 8) * 8)
    n_pad = ((n_rows + tm - 1) // tm) * tm
    return tm, n_pad


def _vmem_cap_bytes():
    """Generation-aware VMEM cap (with headroom for Mosaic internal scratch)."""
    physical = 64 << 20                      # conservative: v7x per-TC VMEM
    try:
        info = pltpu.get_tpu_info()
        for attr in ("vmem_capacity_bytes", "vmem_bytes", "vmem_size_bytes"):
            v = getattr(info, attr, None)
            if v:
                physical = int(v)
                break
    except Exception:
        pass
    return int(physical * 0.85)


def fused_transformer(h, p, *, tm):
    n_pad, E = h.shape
    L = int(p["wvT"].shape[0])
    H = int(p["w1T"].shape[2])
    G = n_pad // tm
    assert n_pad % tm == 0
    mm_dtype = p["wvT"].dtype
    mm_isz = p["wvT"].dtype.itemsize

    # Block specs: per-layer weight streaming (block index follows the layer
    # grid axis -> only ~2 layers' weights ever resident, double-buffered).
    row_in = pl.BlockSpec((tm, E), lambda i, l: (i, 0))          # resident across l
    per_layer = lambda *s: pl.BlockSpec((1,) + s, lambda i, l: (l, 0, 0))
    invariant = lambda *s: pl.BlockSpec(s, lambda i, l: (0, 0))
    out_spec = pl.BlockSpec((1, tm), lambda i, l: (0, i))        # lane-dense output

    # VMEM budget: streamed layer weights (x2 buffers) + x rows (x2) + scratch
    # accumulator + FFN intermediate + f32 temporaries + bf16 operand copies.
    per_layer_w_bytes = (2 * E * E + 2 * E * H) * mm_isz
    per_layer_small_bytes = (6 * E + H) * 4
    est = (2 * (per_layer_w_bytes + per_layer_small_bytes)
           + 2 * tm * E * 4            # x row tile (double-buffered)
           + tm * E * 4                # x_acc scratch
           + tm * H * 4                # FFN intermediate (f32)
           + 4 * tm * E * 4            # h, v, attn, h2 temporaries
           + tm * (E + H) * mm_isz     # bf16 cast copies of matmul operands
           + (2 * E + 2 * tm) * 4      # out_w / out_b / output tile
           + (2 << 20))                # headroom
    vmem_limit = int(min(_vmem_cap_bytes(), max(est, 32 << 20)))

    cost = pl.CostEstimate(
        flops=int(2 * n_pad * L * (2 * E * E + 2 * E * H) + 2 * n_pad * E),
        transcendentals=int(2 * n_pad * L),
        bytes_accessed=int(G * L * (per_layer_w_bytes + per_layer_small_bytes)
                           + n_pad * E * 4 + n_pad * 4),
    )

    kernel = functools.partial(transformer_layer_kernel, mm_dtype=mm_dtype)

    return pl.pallas_call(
        kernel,
        out_shape=jax.ShapeDtypeStruct((1, n_pad), jnp.float32),
        grid=(G, L),
        in_specs=[
            row_in,                                              # x rows
            per_layer(1, E), per_layer(1, E),                    # ln1 gamma / beta
            per_layer(E, E), per_layer(E, E), per_layer(1, E),   # WvT, WoT, bo
            per_layer(1, E), per_layer(1, E),                    # ln2 gamma / beta
            per_layer(E, H), per_layer(1, H),                    # W1T, b1
            per_layer(H, E), per_layer(1, E),                    # W2T, b2
            invariant(1, E), invariant(1, 1),                    # out_w, out_b
        ],
        out_specs=out_spec,
        scratch_shapes=[pltpu.VMEM((tm, E), jnp.float32)],       # carried residual stream
        compiler_params=pltpu.CompilerParams(
            dimension_semantics=("parallel", "arbitrary"),
            vmem_limit_bytes=vmem_limit),
        cost_estimate=cost,
    )(h, p["ln1_g"], p["ln1_b"],
      p["wvT"], p["woT"], p["bo"],
      p["ln2_g"], p["ln2_b"],
      p["w1T"], p["b1"], p["w2T"], p["b2"],
      p["out_w"], p["out_b"])


@jax.jit
def transformer_forward(x, packed):
    B, S, E = x.shape
    N = B * S
    h = x.reshape(N, E).astype(jnp.float32)
    tm, n_pad = _choose_tiling(N)
    if n_pad != N:
        h = jnp.pad(h, ((0, n_pad - N), (0, 0)))   # padded rows never mix with real rows
    y = fused_transformer(h, packed, tm=tm)        # (1, n_pad), lane dense
    return y[0, :N].reshape(B, S, 1)


# --------------------------- params & packing --------------------------------


def _linear_init(key, out_f, in_f, bias=True):
    bound = 1.0 / (in_f ** 0.5)
    kw, kb = jax.random.split(key)
    w = jax.random.uniform(kw, (out_f, in_f), jnp.float32, -bound, bound)
    if not bias:
        return w
    b = jax.random.uniform(kb, (1, out_f), jnp.float32, -bound, bound)
    return w, b


def init_params(key, dim, n_head, n_layers):
    assert dim % n_head == 0
    head_dim = dim // n_head
    # The PyTorch Q/K/V Linear(head_dim, head_dim) is applied to a `dim`-wide
    # input, so the module only type-checks when n_head == 1.
    assert head_dim == dim, "module only type-checks for n_head == 1"
    hidden = 4 * dim
    layers = []
    for _ in range(n_layers):
        key, k1, k2, k3, k4, k5, k6 = jax.random.split(key, 7)
        wq = _linear_init(k1, head_dim, head_dim, bias=False)
        wk = _linear_init(k2, head_dim, head_dim, bias=False)
        wv = _linear_init(k3, head_dim, head_dim, bias=False)
        wo, bo = _linear_init(k4, dim, dim)
        w1, b1 = _linear_init(k5, hidden, dim)
        w2, b2 = _linear_init(k6, dim, hidden)
        layers.append(dict(
            ln1_g=jnp.ones((1, dim), jnp.float32), ln1_b=jnp.zeros((1, dim), jnp.float32),
            wq=wq, wk=wk, wv=wv, wo=wo, bo=bo,
            ln2_g=jnp.ones((1, dim), jnp.float32), ln2_b=jnp.zeros((1, dim), jnp.float32),
            w1=w1, b1=b1, w2=w2, b2=b2,
        ))
    key, ko = jax.random.split(key)
    out_w, out_b = _linear_init(ko, 1, dim)
    return dict(layers=layers, out_w=out_w, out_b=out_b)


def pack_params(params, matmul_dtype=jnp.bfloat16):
    """Pre-transpose (W -> W^T) and stack layer weights once; matmul operands
    default to bf16 (f32 accumulation in the kernel).  wq/wk are intentionally
    NOT packed: with heads == 1 the softmax is exactly 1.0 so they never affect
    the forward output."""
    ls = params["layers"]
    dim = ls[0]["wo"].shape[0]
    for lyr in ls:  # guard the heads==1 simplification at packing time too
        assert lyr["wv"].shape == (dim, dim), "fused kernel requires n_head == 1"
    stk = lambda name: jnp.stack([l[name] for l in ls])                        # (L,1,F) f32
    stk_t = lambda name: jnp.stack([l[name].T for l in ls]).astype(matmul_dtype)
    return dict(
        ln1_g=stk("ln1_g"), ln1_b=stk("ln1_b"),
        wvT=stk_t("wv"), woT=stk_t("wo"), bo=stk("bo"),
        ln2_g=stk("ln2_g"), ln2_b=stk("ln2_b"),
        w1T=stk_t("w1"), b1=stk("b1"),
        w2T=stk_t("w2"), b2=stk("b2"),
        out_w=params["out_w"],                                                 # (1,E) f32
        out_b=params["out_b"],                                                 # (1,1) f32
    )


# ------------------------------- reference -----------------------------------


def _ln_ref(x, g, b):
    mu = x.mean(-1, keepdims=True)
    var = ((x - mu) ** 2).mean(-1, keepdims=True)
    return (x - mu) / jnp.sqrt(var + LN_EPS) * g + b


def reference_forward(x, params):
    """Literal (f32) translation of the PyTorch module, incl. the Q/K/softmax path."""
    B, S, E = x.shape
    h = x.reshape(B * S, E)
    for p in params["layers"]:
        a = _ln_ref(h, p["ln1_g"], p["ln1_b"])
        q, k, v = a @ p["wq"].T, a @ p["wk"].T, a @ p["wv"].T
        energy = jnp.sum(q * k, axis=-1, keepdims=True)                       # heads==1
        attn_w = jax.nn.softmax(energy / jnp.sqrt(jnp.float32(E)), axis=-1)   # == 1.0
        ctx = attn_w * v
        h = h + (ctx @ p["wo"].T + p["bo"])
        f = _ln_ref(h, p["ln2_g"], p["ln2_b"])
        f = jnp.maximum(f @ p["w1"].T + p["b1"], 0.0) @ p["w2"].T + p["b2"]
        h = h + f
    y = h @ params["out_w"].T + params["out_b"]
    return y.reshape(B, S, 1)


# ----------------------------------- main -------------------------------------

if __name__ == "__main__":
    key = jax.random.PRNGKey(0)
    kx, kp = jax.random.split(key)

    # Small config (n_head must be 1 -- the only config the PyTorch module accepts).
    B, S, DIM, N_HEAD, N_LAYERS = 2, 8, 32, 1, 2
    x = jax.random.normal(kx, (B, S, DIM), dtype=jnp.float32)
    params = init_params(kp, DIM, N_HEAD, N_LAYERS)
    ref = reference_forward(x, params)

    # 1) f32 matmuls: faithful to the module math.
    packed_f32 = pack_params(params, matmul_dtype=jnp.float32)
    out = jax.block_until_ready(transformer_forward(x, packed_f32))
    assert out.shape == (B, S, 1), out.shape
    if not jnp.allclose(out, ref, atol=1e-4, rtol=1e-4):
        raise AssertionError("Pallas (f32) output does not match JAX reference")

    # 2) bf16 MXU operands (default perf path), f32 accumulation / LN / residuals.
    packed_bf16 = pack_params(params)
    out_bf16 = jax.block_until_ready(transformer_forward(x, packed_bf16))
    if not jnp.allclose(out_bf16, ref, atol=5e-2, rtol=5e-2):
        raise AssertionError("Pallas (bf16 matmul) output does not match JAX reference")

    # 3) Larger token count: multi-tile row grid, MXU-aligned (N=512 -> tm=256, grid=(2, L)).
    x2 = jax.random.normal(jax.random.PRNGKey(1), (4, 128, DIM), dtype=jnp.float32)
    out2 = jax.block_until_ready(transformer_forward(x2, packed_f32))
    ref2 = reference_forward(x2, params)
    if not jnp.allclose(out2, ref2, atol=1e-4, rtol=1e-4):
        raise AssertionError("Pallas (multi-tile) output does not match JAX reference")

    # 4) Awkward token count: exercises the zero-row-padding path (N=117 -> tm=120).
    x3 = jax.random.normal(jax.random.PRNGKey(2), (3, 39, DIM), dtype=jnp.float32)
    out3 = jax.block_until_ready(transformer_forward(x3, packed_f32))
    ref3 = reference_forward(x3, params)
    if not jnp.allclose(out3, ref3, atol=1e-4, rtol=1e-4):
        raise AssertionError("Pallas (padded rows) output does not match JAX reference")

    print("KERNEL_OK")
</pallas_src>

<mosaic_0001>
module attributes {stable_mosaic.version = 11 : i64} {
  func.func @transformer_layer_kernel(%arg0: i32, %arg1: i32, %arg2: memref<16x32xf32, #tpu.memory_space<vmem>>, %arg3: memref<1x1x32xf32, #tpu.memory_space<vmem>>, %arg4: memref<1x1x32xf32, #tpu.memory_space<vmem>>, %arg5: memref<1x32x32xf32, #tpu.memory_space<vmem>>, %arg6: memref<1x32x32xf32, #tpu.memory_space<vmem>>, %arg7: memref<1x1x32xf32, #tpu.memory_space<vmem>>, %arg8: memref<1x1x32xf32, #tpu.memory_space<vmem>>, %arg9: memref<1x1x32xf32, #tpu.memory_space<vmem>>, %arg10: memref<1x32x128xf32, #tpu.memory_space<vmem>>, %arg11: memref<1x1x128xf32, #tpu.memory_space<vmem>>, %arg12: memref<1x128x32xf32, #tpu.memory_space<vmem>>, %arg13: memref<1x1x32xf32, #tpu.memory_space<vmem>>, %arg14: memref<1x32xf32, #tpu.memory_space<vmem>>, %arg15: memref<1x1xf32, #tpu.memory_space<vmem>>, %arg16: memref<1x16xf32, #tpu.memory_space<vmem>>, %arg17: memref<16x32xf32, #tpu.memory_space<vmem>>) attributes {dimension_semantics = [#tpu.dimension_semantics<parallel>, #tpu.dimension_semantics<arbitrary>], iteration_bounds = array<i64: 1, 2>, scalar_prefetch = 0 : i64, scratch_operands = 1 : i64, tpu.core_type = #tpu.core_type<tc>, window_params = [{transform_indices = @transform_0, window_bounds = array<i64: 16, 32>}, {transform_indices = @transform_1, window_bounds = array<i64: 1, 1, 32>}, {transform_indices = @transform_2, window_bounds = array<i64: 1, 1, 32>}, {transform_indices = @transform_3, window_bounds = array<i64: 1, 32, 32>}, {transform_indices = @transform_4, window_bounds = array<i64: 1, 32, 32>}, {transform_indices = @transform_5, window_bounds = array<i64: 1, 1, 32>}, {transform_indices = @transform_6, window_bounds = array<i64: 1, 1, 32>}, {transform_indices = @transform_7, window_bounds = array<i64: 1, 1, 32>}, {transform_indices = @transform_8, window_bounds = array<i64: 1, 32, 128>}, {transform_indices = @transform_9, window_bounds = array<i64: 1, 1, 128>}, {transform_indices = @transform_10, window_bounds = array<i64: 1, 128, 32>}, {transform_indices = @transform_11, window_bounds = array<i64: 1, 1, 32>}, {pipeline_mode = #tpu.pipeline_mode<synchronous>, transform_indices = @transform_12, window_bounds = array<i64: 1, 32>}, {pipeline_mode = #tpu.pipeline_mode<synchronous>, transform_indices = @transform_13, window_bounds = array<i64: 1, 1>}, {transform_indices = @transform_14, window_bounds = array<i64: 1, 16>}]} {
    %c0_i32 = arith.constant 0 : i32
    %0 = arith.cmpi eq, %arg1, %c0_i32 : i32
    %1 = arith.extui %0 : i1 to i32
    %c0_i32_0 = arith.constant 0 : i32
    %2 = arith.cmpi ne, %1, %c0_i32_0 : i32
    scf.if %2 {
      %c0_52 = arith.constant 0 : index
      %c0_53 = arith.constant 0 : index
      %88 = vector.load %arg2[%c0_52, %c0_53] : memref<16x32xf32, #tpu.memory_space<vmem>>, vector<16x32xf32>
      %c0_54 = arith.constant 0 : index
      %c0_55 = arith.constant 0 : index
      %89 = vector.load %arg17[%c0_54, %c0_55] : memref<16x32xf32, #tpu.memory_space<vmem>>, vector<16x32xf32>
      tpu.vector_store %arg17[%c0_54, %c0_55], %88 {strides = array<i32>} : memref<16x32xf32, #tpu.memory_space<vmem>>, vector<16x32xf32>,
    } else {
    }
    %c0 = arith.constant 0 : index
    %c0_1 = arith.constant 0 : index
    %3 = vector.load %arg17[%c0, %c0_1] : memref<16x32xf32, #tpu.memory_space<vmem>>, vector<16x32xf32>
    %c0_2 = arith.constant 0 : index
    %c0_3 = arith.constant 0 : index
    %c0_4 = arith.constant 0 : index
    %4 = vector.load %arg3[%c0_2, %c0_3, %c0_4] : memref<1x1x32xf32, #tpu.memory_space<vmem>>, vector<1x1x32xf32>
    %5 = vector.shape_cast %4 : vector<1x1x32xf32> to vector<1x32xf32>
    %c0_5 = arith.constant 0 : index
    %c0_6 = arith.constant 0 : index
    %c0_7 = arith.constant 0 : index
    %6 = vector.load %arg4[%c0_5, %c0_6, %c0_7] : memref<1x1x32xf32, #tpu.memory_space<vmem>>, vector<1x1x32xf32>
    %7 = vector.shape_cast %6 : vector<1x1x32xf32> to vector<1x32xf32>
    %cst = arith.constant dense<0.000000e+00> : vector<16xf32>
    %8 = vector.multi_reduction <add>, %3, %cst [1] : vector<16x32xf32> to vector<16xf32>
    %9 = vector.shape_cast %8 : vector<16xf32> to vector<16x1xf32>
    %cst_8 = arith.constant 3.200000e+01 : f32
    %10 = vector.broadcast %cst_8 : f32 to vector<16x1xf32>
    %11 = arith.divf %9, %10 : vector<16x1xf32>
    %12 = vector.broadcast %11 : vector<16x1xf32> to vector<16x32xf32>
    %13 = arith.subf %3, %12 : vector<16x32xf32>
    %14 = arith.mulf %13, %13 : vector<16x32xf32>
    %cst_9 = arith.constant dense<0.000000e+00> : vector<16xf32>
    %15 = vector.multi_reduction <add>, %14, %cst_9 [1] : vector<16x32xf32> to vector<16xf32>
    %16 = vector.shape_cast %15 : vector<16xf32> to vector<16x1xf32>
    %cst_10 = arith.constant 3.200000e+01 : f32
    %17 = vector.broadcast %cst_10 : f32 to vector<16x1xf32>
    %18 = arith.divf %16, %17 : vector<16x1xf32>
    %19 = vector.broadcast %11 : vector<16x1xf32> to vector<16x32xf32>
    %20 = arith.subf %3, %19 : vector<16x32xf32>
    %cst_11 = arith.constant 9.99999974E-6 : f32
    %21 = vector.broadcast %cst_11 : f32 to vector<16x1xf32>
    %22 = arith.addf %18, %21 : vector<16x1xf32>
    %23 = math.rsqrt %22 : vector<16x1xf32>
    %24 = vector.broadcast %23 : vector<16x1xf32> to vector<16x32xf32>
    %25 = arith.mulf %20, %24 : vector<16x32xf32>
    %26 = vector.broadcast %5 : vector<1x32xf32> to vector<16x32xf32>
    %27 = arith.mulf %25, %26 : vector<16x32xf32>
    %28 = vector.broadcast %7 : vector<1x32xf32> to vector<16x32xf32>
    %29 = arith.addf %27, %28 : vector<16x32xf32>
    %c0_12 = arith.constant 0 : index
    %c0_13 = arith.constant 0 : index
    %c0_14 = arith.constant 0 : index
    %30 = vector.load %arg5[%c0_12, %c0_13, %c0_14] : memref<1x32x32xf32, #tpu.memory_space<vmem>>, vector<1x32x32xf32>
    %31 = vector.shape_cast %30 : vector<1x32x32xf32> to vector<32x32xf32>
    %cst_15 = arith.constant dense<0.000000e+00> : vector<16x32xf32>
    %32 = tpu.matmul %29, %31, %cst_15 {dimension_numbers = #tpu.dot_dimension_numbers<[1], [0], [0], [1], [0, 0, 1, 1], [], []>} : vector<16x32xf32>, vector<32x32xf32>, vector<16x32xf32> -> vector<16x32xf32>
    %c0_16 = arith.constant 0 : index
    %c0_17 = arith.constant 0 : index
    %c0_18 = arith.constant 0 : index
    %33 = vector.load %arg6[%c0_16, %c0_17, %c0_18] : memref<1x32x32xf32, #tpu.memory_space<vmem>>, vector<1x32x32xf32>
    %34 = vector.shape_cast %33 : vector<1x32x32xf32> to vector<32x32xf32>
    %cst_19 = arith.constant dense<0.000000e+00> : vector<16x32xf32>
    %35 = tpu.matmul %32, %34, %cst_19 {dimension_numbers = #tpu.dot_dimension_numbers<[1], [0], [0], [1], [0, 0, 1, 1], [], []>} : vector<16x32xf32>, vector<32x32xf32>, vector<16x32xf32> -> vector<16x32xf32>
    %c0_20 = arith.constant 0 : index
    %c0_21 = arith.constant 0 : index
    %c0_22 = arith.constant 0 : index
    %36 = vector.load %arg7[%c0_20, %c0_21, %c0_22] : memref<1x1x32xf32, #tpu.memory_space<vmem>>, vector<1x1x32xf32>
    %37 = vector.shape_cast %36 : vector<1x1x32xf32> to vector<1x32xf32>
    %38 = vector.broadcast %37 : vector<1x32xf32> to vector<16x32xf32>
    %39 = arith.addf %35, %38 : vector<16x32xf32>
    %40 = arith.addf %3, %39 : vector<16x32xf32>
    %c0_23 = arith.constant 0 : index
    %c0_24 = arith.constant 0 : index
    %c0_25 = arith.constant 0 : index
    %41 = vector.load %arg8[%c0_23, %c0_24, %c0_25] : memref<1x1x32xf32, #tpu.memory_space<vmem>>, vector<1x1x32xf32>
    %42 = vector.shape_cast %41 : vector<1x1x32xf32> to vector<1x32xf32>
    %c0_26 = arith.constant 0 : index
    %c0_27 = arith.constant 0 : index
    %c0_28 = arith.constant 0 : index
    %43 = vector.load %arg9[%c0_26, %c0_27, %c0_28] : memref<1x1x32xf32, #tpu.memory_space<vmem>>, vector<1x1x32xf32>
    %44 = vector.shape_cast %43 : vector<1x1x32xf32> to vector<1x32xf32>
    %cst_29 = arith.constant dense<0.000000e+00> : vector<16xf32>
    %45 = vector.multi_reduction <add>, %40, %cst_29 [1] : vector<16x32xf32> to vector<16xf32>
    %46 = vector.shape_cast %45 : vector<16xf32> to vector<16x1xf32>
    %cst_30 = arith.constant 3.200000e+01 : f32
    %47 = vector.broadcast %cst_30 : f32 to vector<16x1xf32>
    %48 = arith.divf %46, %47 : vector<16x1xf32>
    %49 = vector.broadcast %48 : vector<16x1xf32> to vector<16x32xf32>
    %50 = arith.subf %40, %49 : vector<16x32xf32>
    %51 = arith.mulf %50, %50 : vector<16x32xf32>
    %cst_31 = arith.constant dense<0.000000e+00> : vector<16xf32>
    %52 = vector.multi_reduction <add>, %51, %cst_31 [1] : vector<16x32xf32> to vector<16xf32>
    %53 = vector.shape_cast %52 : vector<16xf32> to vector<16x1xf32>
    %cst_32 = arith.constant 3.200000e+01 : f32
    %54 = vector.broadcast %cst_32 : f32 to vector<16x1xf32>
    %55 = arith.divf %53, %54 : vector<16x1xf32>
    %56 = vector.broadcast %48 : vector<16x1xf32> to vector<16x32xf32>
    %57 = arith.subf %40, %56 : vector<16x32xf32>
    %cst_33 = arith.constant 9.99999974E-6 : f32
    %58 = vector.broadcast %cst_33 : f32 to vector<16x1xf32>
    %59 = arith.addf %55, %58 : vector<16x1xf32>
    %60 = math.rsqrt %59 : vector<16x1xf32>
    %61 = vector.broadcast %60 : vector<16x1xf32> to vector<16x32xf32>
    %62 = arith.mulf %57, %61 : vector<16x32xf32>
    %63 = vector.broadcast %42 : vector<1x32xf32> to vector<16x32xf32>
    %64 = arith.mulf %62, %63 : vector<16x32xf32>
    %65 = vector.broadcast %44 : vector<1x32xf32> to vector<16x32xf32>
    %66 = arith.addf %64, %65 : vector<16x32xf32>
    %c0_34 = arith.constant 0 : index
    %c0_35 = arith.constant 0 : index
    %c0_36 = arith.constant 0 : index
    %67 = vector.load %arg10[%c0_34, %c0_35, %c0_36] : memref<1x32x128xf32, #tpu.memory_space<vmem>>, vector<1x32x128xf32>
    %68 = vector.shape_cast %67 : vector<1x32x128xf32> to vector<32x128xf32>
    %cst_37 = arith.constant dense<0.000000e+00> : vector<16x128xf32>
    %69 = tpu.matmul %66, %68, %cst_37 {dimension_numbers = #tpu.dot_dimension_numbers<[1], [0], [0], [1], [0, 0, 1, 1], [], []>} : vector<16x32xf32>, vector<32x128xf32>, vector<16x128xf32> -> vector<16x128xf32>
    %c0_38 = arith.constant 0 : index
    %c0_39 = arith.constant 0 : index
    %c0_40 = arith.constant 0 : index
    %70 = vector.load %arg11[%c0_38, %c0_39, %c0_40] : memref<1x1x128xf32, #tpu.memory_space<vmem>>, vector<1x1x128xf32>
    %71 = vector.shape_cast %70 : vector<1x1x128xf32> to vector<1x128xf32>
    %72 = vector.broadcast %71 : vector<1x128xf32> to vector<16x128xf32>
    %73 = arith.addf %69, %72 : vector<16x128xf32>
    %cst_41 = arith.constant 0.000000e+00 : f32
    %74 = vector.broadcast %cst_41 : f32 to vector<16x128xf32>
    %75 = arith.maximumf %73, %74 : vector<16x128xf32>
    %c0_42 = arith.constant 0 : index
    %c0_43 = arith.constant 0 : index
    %c0_44 = arith.constant 0 : index
    %76 = vector.load %arg12[%c0_42, %c0_43, %c0_44] : memref<1x128x32xf32, #tpu.memory_space<vmem>>, vector<1x128x32xf32>
    %77 = vector.shape_cast %76 : vector<1x128x32xf32> to vector<128x32xf32>
    %cst_45 = arith.constant dense<0.000000e+00> : vector<16x32xf32>
    %78 = tpu.matmul %75, %77, %cst_45 {dimension_numbers = #tpu.dot_dimension_numbers<[1], [0], [0], [1], [0, 0, 1, 1], [], []>} : vector<16x128xf32>, vector<128x32xf32>, vector<16x32xf32> -> vector<16x32xf32>
    %c0_46 = arith.constant 0 : index
    %c0_47 = arith.constant 0 : index
    %c0_48 = arith.constant 0 : index
    %79 = vector.load %arg13[%c0_46, %c0_47, %c0_48] : memref<1x1x32xf32, #tpu.memory_space<vmem>>, vector<1x1x32xf32>
    %80 = vector.shape_cast %79 : vector<1x1x32xf32> to vector<1x32xf32>
    %81 = vector.broadcast %80 : vector<1x32xf32> to vector<16x32xf32>
    %82 = arith.addf %78, %81 : vector<16x32xf32>
    %83 = arith.addf %40, %82 : vector<16x32xf32>
    %c0_49 = arith.constant 0 : index
    %c0_50 = arith.constant 0 : index
    %84 = vector.load %arg17[%c0_49, %c0_50] : memref<16x32xf32, #tpu.memory_space<vmem>>, vector<16x32xf32>
    tpu.vector_store %arg17[%c0_49, %c0_50], %83 {strides = array<i32>} : memref<16x32xf32, #tpu.memory_space<vmem>>, vector<16x32xf32>,
    %c1_i32 = arith.constant 1 : i32
    %85 = arith.cmpi eq, %arg1, %c1_i32 : i32
    %86 = arith.extui %85 : i1 to i32
    %c0_i32_51 = arith.constant 0 : i32
    %87 = arith.cmpi ne, %86, %c0_i32_51 : i32
    scf.if %87 {
      %c0_52 = arith.constant 0 : index
      %c0_53 = arith.constant 0 : index
      %88 = vector.load %arg14[%c0_52, %c0_53] : memref<1x32xf32, #tpu.memory_space<vmem>>, vector<1x32xf32>
      %89 = vector.broadcast %88 : vector<1x32xf32> to vector<16x32xf32>
      %90 = arith.mulf %83, %89 : vector<16x32xf32>
      %cst_54 = arith.constant dense<0.000000e+00> : vector<16xf32>
      %91 = vector.multi_reduction <add>, %90, %cst_54 [1] : vector<16x32xf32> to vector<16xf32>
      %92 = vector.shape_cast %91 : vector<16xf32> to vector<1x16xf32>
      %c0_55 = arith.constant 0 : index
      %c0_56 = arith.constant 0 : index
      %93 = vector.load %arg15[%c0_55, %c0_56] : memref<1x1xf32, #tpu.memory_space<vmem>>, vector<1x1xf32>
      %94 = vector.broadcast %93 : vector<1x1xf32> to vector<1x16xf32>
      %95 = arith.addf %92, %94 : vector<1x16xf32>
      %c0_57 = arith.constant 0 : index
      %c0_58 = arith.constant 0 : index
      %96 = vector.load %arg16[%c0_57, %c0_58] : memref<1x16xf32, #tpu.memory_space<vmem>>, vector<1x16xf32>
      tpu.vector_store %arg16[%c0_57, %c0_58], %95 {strides = array<i32>} : memref<1x16xf32, #tpu.memory_space<vmem>>, vector<1x16xf32>,
    } else {
    }
    return
  }
  func.func @transform_0(%arg0: i32, %arg1: i32) -> (i32, i32) {
    %c0_i32 = arith.constant 0 : i32
    %c0_i32_0 = arith.constant 0 : i32
    return %arg0, %c0_i32 : i32, i32
  }
  func.func @transform_1(%arg0: i32, %arg1: i32) -> (i32, i32, i32) {
    %c0_i32 = arith.constant 0 : i32
    %c0_i32_0 = arith.constant 0 : i32
    %c0_i32_1 = arith.constant 0 : i32
    return %arg1, %c0_i32, %c0_i32_0 : i32, i32, i32
  }
  func.func @transform_2(%arg0: i32, %arg1: i32) -> (i32, i32, i32) {
    %c0_i32 = arith.constant 0 : i32
    %c0_i32_0 = arith.constant 0 : i32
    %c0_i32_1 = arith.constant 0 : i32
    return %arg1, %c0_i32, %c0_i32_0 : i32, i32, i32
  }
  func.func @transform_3(%arg0: i32, %arg1: i32) -> (i32, i32, i32) {
    %c0_i32 = arith.constant 0 : i32
    %c0_i32_0 = arith.constant 0 : i32
    %c0_i32_1 = arith.constant 0 : i32
    return %arg1, %c0_i32, %c0_i32_0 : i32, i32, i32
  }
  func.func @transform_4(%arg0: i32, %arg1: i32) -> (i32, i32, i32) {
    %c0_i32 = arith.constant 0 : i32
    %c0_i32_0 = arith.constant 0 : i32
    %c0_i32_1 = arith.constant 0 : i32
    return %arg1, %c0_i32, %c0_i32_0 : i32, i32, i32
  }
  func.func @transform_5(%arg0: i32, %arg1: i32) -> (i32, i32, i32) {
    %c0_i32 = arith.constant 0 : i32
    %c0_i32_0 = arith.constant 0 : i32
    %c0_i32_1 = arith.constant 0 : i32
    return %arg1, %c0_i32, %c0_i32_0 : i32, i32, i32
  }
  func.func @transform_6(%arg0: i32, %arg1: i32) -> (i32, i32, i32) {
    %c0_i32 = arith.constant 0 : i32
    %c0_i32_0 = arith.constant 0 : i32
    %c0_i32_1 = arith.constant 0 : i32
    return %arg1, %c0_i32, %c0_i32_0 : i32, i32, i32
  }
  func.func @transform_7(%arg0: i32, %arg1: i32) -> (i32, i32, i32) {
    %c0_i32 = arith.constant 0 : i32
    %c0_i32_0 = arith.constant 0 : i32
    %c0_i32_1 = arith.constant 0 : i32
    return %arg1, %c0_i32, %c0_i32_0 : i32, i32, i32
  }
  func.func @transform_8(%arg0: i32, %arg1: i32) -> (i32, i32, i32) {
    %c0_i32 = arith.constant 0 : i32
    %c0_i32_0 = arith.constant 0 : i32
    %c0_i32_1 = arith.constant 0 : i32
    return %arg1, %c0_i32, %c0_i32_0 : i32, i32, i32
  }
  func.func @transform_9(%arg0: i32, %arg1: i32) -> (i32, i32, i32) {
    %c0_i32 = arith.constant 0 : i32
    %c0_i32_0 = arith.constant 0 : i32
    %c0_i32_1 = arith.constant 0 : i32
    return %arg1, %c0_i32, %c0_i32_0 : i32, i32, i32
  }
  func.func @transform_10(%arg0: i32, %arg1: i32) -> (i32, i32, i32) {
    %c0_i32 = arith.constant 0 : i32
    %c0_i32_0 = arith.constant 0 : i32
    %c0_i32_1 = arith.constant 0 : i32
    return %arg1, %c0_i32, %c0_i32_0 : i32, i32, i32
  }
  func.func @transform_11(%arg0: i32, %arg1: i32) -> (i32, i32, i32) {
    %c0_i32 = arith.constant 0 : i32
    %c0_i32_0 = arith.constant 0 : i32
    %c0_i32_1 = arith.constant 0 : i32
    return %arg1, %c0_i32, %c0_i32_0 : i32, i32, i32
  }
  func.func @transform_12(%arg0: i32, %arg1: i32) -> (i32, i32) {
    %c0_i32 = arith.constant 0 : i32
    %c0_i32_0 = arith.constant 0 : i32
    %c0_i32_1 = arith.constant 0 : i32
    return %c0_i32, %c0_i32_0 : i32, i32
  }
  func.func @transform_13(%arg0: i32, %arg1: i32) -> (i32, i32) {
    %c0_i32 = arith.constant 0 : i32
    %c0_i32_0 = arith.constant 0 : i32
    %c0_i32_1 = arith.constant 0 : i32
    return %c0_i32, %c0_i32_0 : i32, i32
  }
  func.func @transform_14(%arg0: i32, %arg1: i32) -> (i32, i32) {
    %c0_i32 = arith.constant 0 : i32
    %c0_i32_0 = arith.constant 0 : i32
    return %c0_i32, %arg0 : i32, i32
  }
}

</mosaic_0001>

<bundles_post_ra>
// kernel: squeeze.1
= control target key start
LH: loop header
LB: loop body
LE: loop exit
PB: predicated region body
PF: predicated region fallthrough
CT: control target
= control target key end

     0   :  { %s85_s0 = inlined_call_operand.vmem [shape: f32[16], index: 0, kind: input, shape index: {}]   ;;  %s86_s1 = inlined_call_operand.hbm [shape: f32[2,8,1], index: 1, kind: output, shape index: {}]  }
   0x1   :  { %v5_v0 = vld [vmem:[%s85_s0] sm:$0x1] }
   0x2   :  { %2 = vsyncpa [#allocation1], 0  ;;  %6 = vst [vmem:[#allocation3] sm:$0x1] %v5_v0  ;;  %vm8_vm0 = vcmask 64512   ;;  %s58_s0 = smov 120  }
   0x3   :  { %s59_s8 = smov [#allocation0]  }
   0x4   :  { %s26_s9 = sshll.u32 %s59_s8, 4  ;;  %s27_s9 = int_to_ptr.vmem [resolvable:$true] %s26_s9 }
   0x5   :  { %s34_s10 = scalar_lea.vmem %s27_s9, 32  ;;  %p39_p1 = scmp.lt.s32.totalorder %s27_s9, %s27_s9 }
   0x6   :  { %p35_p0 = scmp.ne.s32.totalorder %s27_s9, %s34_s10  ;;  %p40_p2 = scmp.lt.s32.totalorder %s34_s10, %s34_s10 }
   0x8   :  { %p41_p3 = por %p40_p2, %p39_p1 }
   0x9   :  { %v10_v1 = vld [vmem:[#allocation3] sm:$0x1]  }
   0xa   :  { %v7_v2 = vld [vmem:[#allocation3] sm:$0x1]   ;;  %11 = vrot.lane.b32.xlu0 %v10_v1, %s58_s0  ;;  %p42_p4 = pnand %p41_p3, %p35_p0 }
   0xb   :  { %9 = vst.msk [vmem:[#allocation2] sm:$0x1] %vm8_vm0, %v7_v2  }
  0x7c   :  { %v12_v3 = vpop.permute.xlu0 %11  }
  0x7d   :  { %15 = vst.msk [vmem:[#allocation2 + $0x1] sm:$0x1] %vm8_vm0, %v12_v3  }
  0x84   :  { %v19_v4 = vld [vmem:[#allocation2] sm:$0x3] }
  0x85   :  { %21 = vst [vmem:[#allocation0] sm:$0x3] %v19_v4 }
  0x86   :  { %45 = shalt.err (!%p42_p4)
}
  0x87   :  { %s46_s13 = scalar_lea.hbm %s86_s1, 32 }
  0x88   :  { %p47_p5 = scmp.ne.s32.totalorder %s86_s1, %s46_s13  ;;  %p50_p6 = scmp.lt.u32.totalorder %s46_s13, %s86_s1 }
  0x8a   :  { %p52_p7 = pnand %p50_p6, %p47_p5 }
  0x8c   :  { %55 = shalt.err (!%p52_p7)
}
  0x8d   :  { %29 = dma.vmem_to_hbm [thread:$0]  %s27_s9, 32, %s86_s1, [#allocation1]  }
  0x8e   :  { %56 = dma.done.wait [#allocation1], 32  }
  0x8f   :  { %57 = vsyncadd [#allocation1], 4294967264 }
  0x90   :  { %31 = vsyncpa [#allocation1], 1 }

// kernel: transformer_forward.1
= control target key start
LH: loop header
LB: loop body
LE: loop exit
PB: predicated region body
PF: predicated region fallthrough
CT: control target
= control target key end

     0   :  { %s1684_s15 = smov 0   ;;  %s1686_s16 = smov 0   ;;  %s1892_s0 = inlined_call_operand.vmem [shape: f32[16,32], index: 0, kind: input, shape index: {}]   ;;  %s1893_s1 = inlined_call_operand.vmem [shape: f32[2,1,32], index: 1, kind: input, shape index: {}]   ;;  %s1894_s2 = inlined_call_operand.vmem [shape: f32[2,1,32], index: 2, kind: input, shape index: {}]   ;;  %s1895_s3 = inlined_call_operand.vmem [shape: f32[2,32,32], index: 3, kind: input, shape index: {}]   ;;  %s1896_s4 = inlined_call_operand.vmem [shape: f32[2,32,32], index: 4, kind: input, shape index: {}]   ;;  %s1897_s5 = inlined_call_operand.vmem [shape: f32[2,1,32], index: 5, kind: input, shape index: {}]   ;;  %s1898_s6 = inlined_call_operand.vmem [shape: f32[2,1,32], index: 6, kind: input, shape index: {}]   ;;  %s1899_s7 = inlined_call_operand.vmem [shape: f32[2,1,32], index: 7, kind: input, shape index: {}]   ;;  %s1900_s8 = inlined_call_operand.vmem [shape: f32[2,32,128], index: 8, kind: input, shape index: {}]   ;;  %s1901_s9 = inlined_call_operand.vmem [shape: f32[2,1,128], index: 9, kind: input, shape index: {}]   ;;  %s1902_s10 = inlined_call_operand.vmem [shape: f32[2,128,32], index: 10, kind: input, shape index: {}]   ;;  %s1903_s11 = inlined_call_operand.vmem [shape: f32[2,1,32], index: 11, kind: input, shape index: {}]   ;;  %s1904_s12 = inlined_call_operand.vmem [shape: f32[1,32], index: 12, kind: input, shape index: {}]   ;;  %s1905_s13 = inlined_call_operand.<no memory space> [shape: f32[1,1], index: 13, kind: input, shape index: {}]   ;;  %s1906_s14 = inlined_call_operand.vmem [shape: f32[1,16], index: 14, kind: output, shape index: {}]  }
   0x1   :  { %1909 = sst [smem:[#allocation7_spill]] %s1895_s3  ;;  %v19_v0 = vstv %s1905_s13  ;;  %s1688_s17 = smov 0  }
   0x2   :  { %1910 = sst [smem:[#allocation8_spill]] %s1896_s4  ;;  %20 = vst [vmem:[#allocation3] sm:$0x1] %v19_v0 }
   0x3   :  { %1911 = sst [smem:[#allocation9_spill]] %s1904_s12 }
   0x4   :  { %1912 = sst [smem:[#allocation10_spill]] %s1906_s14 }
   0x5 LB: > { %1913 = sst [smem:[#allocation4_spill]] %s1599_s16  ;;  %s35_s13 = sadd.s32 1, %s1599_s16  ;;  %s1603_s17 = sphi %s1688_s17, %s26_s17   ;;  %s1599_s16 = sphi %s1686_s16, %s1926_s16   ;;  %s1595_s15 = sphi %s1684_s15, %s1925_s15  }
   0x6   : > { %1914 = sst [smem:[#allocation5_spill]] %s1603_s17  ;;  %p1354_p0 = scmp.ge.s32.totalorder %s1603_s17, 1 }
   0x7   : > { %p36_p1 = scmp.ge.s32.totalorder %s35_s13, 2  ;;  %p523_p2 = scmp.lt.s32.totalorder %s1603_s17, 3 }
   0x9   : > { %s1928_s13 = smov (%p36_p1, %s35_s13), 0  ;;  %p524_p3 = pnand %p1354_p0, %p523_p2 }
   0xa   : > { %1915 = sst [smem:[#allocation6_spill]] %s1928_s13  ;;  %p614_p4 = scmp.lt.s32.totalorder (!%p524_p3), %s1595_s15, 1 }
   0xb   : > { %527 = sbr.rel (%p524_p3) target bundleno = 1680 (0x690), region = 76  ;;  %s1916_s3 = sld [smem:[#allocation7_spill]] (!%p524_p3) }
   0xc   : > { %s1917_s4 = sld [smem:[#allocation8_spill]] (!%p524_p3)  ;;  %p1363_p5 = scmp.ne.s32.totalorder (!%p524_p3), %s1595_s15, 0 }
  0x12   : > { %s1706_s18 = scalar_select %p614_p4, %s1595_s15, 1 }
  0x13   : > { %661 = sbr.rel (%p1363_p5) target bundleno = 26 (0x1a), region = 80  ;;  %v662_v1 = vld [vmem:[%s1892_s0] sm:$0xff] (!%p1363_p5)  ;;  %vm664_vm0 = vcmask (!%p1363_p5), 261120   ;;  %v663_v2 = vld [vmem:[%s1892_s0 + $0x8] sm:$0xff] (!%p1363_p5) }
  0x14   : > { %s1382_s25 = sshll.u32 %s1706_s18, 5  ;;  %s638_s14 = scalar_lea.vmem %s1899_s7, %s1706_s18  ;;  %665 = vst.msk [vmem:[#allocation2] sm:$0xff] (!%p1363_p5), %vm664_vm0, %v662_v1  ;;  %666 = vst.msk [vmem:[#allocation2 + $0x8] sm:$0xff] (!%p1363_p5), %vm664_vm0, %v663_v2 }
  0x15   : > { %s1724_s19 = scalar_lea.vmem %s1916_s3, %s1382_s25  ;;  %s1729_s16 = scalar_lea.vmem %s1917_s4, %s1382_s25 }
  0x16   : > { %s1742_s28 = scalar_lea.vmem %s1900_s8, %s1382_s25  ;;  %s646_s3 = scalar_lea.vmem %s1901_s9, %s1706_s18 }
  0x17   : > { %s1385_s13 = sshll.u32 %s1706_s18, 7  ;;  %s654_s12 = scalar_lea.vmem %s1903_s11, %s1706_s18 }
  0x18   : > { %s1756_s22 = scalar_lea.vmem %s1902_s10, %s1385_s13 }
  0x1a PF: > { %vm671_vm1 = vcmask 261120   ;;  %v715_v17 = vld [vmem:[%s1724_s19] sm:$0xff]  ;;  %v716_v18 = vld [vmem:[%s1724_s19 + $0x8] sm:$0xff]  ;;  %v717_v19 = vld [vmem:[%s1724_s19 + $0x10] sm:$0xff]  ;;  %s1918_s27 = scalar_lea.vmem %s1893_s1, %s1706_s18  ;;  %s1919_s13 = scalar_lea.vmem %s1894_s2, %s1706_s18 }
  0x1b   : > { %v1765_v3 = vld [vmem:[#allocation2] sm:$0xff]  ;;  %v1767_v4 = vld [vmem:[#allocation2 + $0x8] sm:$0xff]  ;;  %v1490_v20 = vpack.c.bf16 %v716_v18, %v715_v17  ;;  %v718_v21 = vld [vmem:[%s1724_s19 + $0x18] sm:$0xff]  ;;  %s1921_s24 = scalar_lea.vmem %s1898_s6, %s1706_s18  ;;  %p1377_p6 = scmp.ne.s32.totalorder %s1595_s15, 1 }
  0x1c   : > { %v672_v5 = vsel %vm671_vm1, %v1765_v3, 0.0  ;;  %v675_v6 = vsel %vm671_vm1, %v1767_v4, 0.0  ;;  %v1494_v22 = vpack.c.bf16 %v718_v21, %v717_v19  ;;  %v800_v23 = vld [vmem:[%s1729_s16] sm:$0xff]  ;;  %v801_v24 = vld [vmem:[%s1729_s16 + $0x8] sm:$0xff]  ;;  %v802_v40 = vld [vmem:[%s1729_s16 + $0x10] sm:$0xff]  ;;  %vm1178_vm2 = vcmask (!%p1377_p6), 130112  }
  0x1d   : > { %673 = vadd.xlane.f32.xlu0 %v672_v5  ;;  %1491 = vmatprep.subr.bf16.mxu0 %v1490_v20  ;;  %v1498_v25 = vpack.c.bf16 %v801_v24, %v800_v23  ;;  %v1364_v33 = vld [vmem:[%s1918_s27] ss:$0 sm:$0xff]  ;;  %v803_v41 = vld [vmem:[%s1729_s16 + $0x18] sm:$0xff]  ;;  %s1920_s16 = scalar_lea.vmem %s1897_s5, %s1706_s18  ;;  %v940_v5 = vld [vmem:[%s1742_s28 + $0x10] sm:$0xff]  ;;  %s1922_s27 = sld [smem:[#allocation9_spill]] (!%p1377_p6)  ;;  %vm1181_vm3 = vcmask (!%p1377_p6), 122880  }
  0x1e   : > { %1493 = vmatpush3.bf16.msra.mxu0 %v1490_v20  ;;  %v1365_v35 = vld [vmem:[%s1919_s13] ss:$0 sm:$0xff]  ;;  %v1502_v44 = vpack.c.bf16 %v803_v41, %v802_v40  ;;  %v1038_v17 = vld [vmem:[%s1756_s22 + $0x30] sm:$0xff]  ;;  %v1039_v18 = vld [vmem:[%s1756_s22 + $0x38] sm:$0xff]  ;;  %s1923_s18 = sld [smem:[#allocation10_spill]] (!%p1377_p6) }
  0x1f   : > { %1495 = vmatprep.subr.bf16.mxu0 %v1494_v22  ;;  %v1368_v47 = vld [vmem:[%s1920_s16] ss:$0 sm:$0xff]  ;;  %v1526_v19 = vpack.c.bf16 %v1039_v18, %v1038_v17  ;;  %v1041_v21 = vld [vmem:[%s1756_s22 + $0x48] sm:$0xff]  ;;  %v1042_v23 = vld [vmem:[%s1756_s22 + $0x50] sm:$0xff] }
  0x20   : > { %v938_v2 = vld [vmem:[%s1742_s28] sm:$0xff]  ;;  %v1043_v24 = vld [vmem:[%s1756_s22 + $0x58] sm:$0xff] }
  0x21   : > { %676 = vadd.xlane.f32.xlu0 %v675_v6  ;;  %v941_v6 = vld [vmem:[%s1742_s28 + $0x18] sm:$0xff]  ;;  %v1040_v20 = vld [vmem:[%s1756_s22 + $0x40] sm:$0xff] }
  0x22   : > { %1497 = vmatpush3.bf16.msra.mxu0 %v1494_v22  ;;  %v1530_v22 = vpack.c.bf16 %v1041_v21, %v1040_v20  ;;  %v1372_v40 = vld [vmem:[%s638_s14] ss:$0 sm:$0xff] }
  0x23   : > { %1499 = vmatprep.subr.bf16.mxu0 %v1498_v25 }
  0xaa   : > { %v674_v7 = vpop.xlane.xlu0 %673 }
  0xab   : > { %v679_v8 = vmul.f32 0.03125, %v674_v7  ;;  %v1510_v7 = vpack.c.bf16 %v941_v6, %v940_v5  ;;  %v1159_v5 = vlaneseq (!%p1377_p6) }
  0xad   : > { %v681_v9 = vsub.f32 %v1765_v3, %v679_v8  ;;  %v1032_v8 = vld [vmem:[%s1756_s22] sm:$0xff]  ;;  %v1160_v6 = vshrl.u32 (!%p1377_p6), %v1159_v5, 7 }
  0xae   : > { %v677_v10 = vpop.xlane.xlu0 %676 }
  0xaf   : > { %v680_v11 = vmul.f32 0.03125, %v677_v10  ;;  %v683_v12 = vmul.f32 %v681_v9, %v681_v9  ;;  %v1034_v10 = vld [vmem:[%s1756_s22 + $0x10] sm:$0xff] }
  0xb1   : > { %v682_v13 = vsub.f32 %v1767_v4, %v680_v11  ;;  %v685_v14 = vsel %vm671_vm1, %v683_v12, 0.0  ;;  %v1035_v12 = vld [vmem:[%s1756_s22 + $0x18] sm:$0xff] }
  0xb2   : > { %686 = vadd.xlane.f32.xlu1 %v685_v14  ;;  %v1036_v14 = vld [vmem:[%s1756_s22 + $0x20] sm:$0xff] }
  0xb3   : > { %v684_v15 = vmul.f32 %v682_v13, %v682_v13 }
  0xb5   : > { %v688_v16 = vsel %vm671_vm1, %v684_v15, 0.0  ;;  %v1037_v15 = vld [vmem:[%s1756_s22 + $0x28] sm:$0xff] }
  0xb6   : > { %689 = vadd.xlane.f32.xlu1 %v688_v16  ;;  %v1522_v16 = vpack.c.bf16 %v1037_v15, %v1036_v14 }
 0x13f   : > { %v687_v26 = vpop.xlane.xlu1 %686 }
 0x140   : > { %v691_v27 = vmul.f32 0.03125, %v687_v26  ;;  %v1044_v26 = vld [vmem:[%s1756_s22 + $0x60] sm:$0xff] }
 0x142   : > { %v693_v28 = vadd.f32 1e-05, %v691_v27  ;;  %v1045_v27 = vld [vmem:[%s1756_s22 + $0x68] sm:$0xff] }
 0x143   : > { %v690_v29 = vpop.xlane.xlu1 %689 }
 0x144   : > { %1571 = vrsqrt.f32 %v693_v28  ;;  %v692_v30 = vmul.f32 0.03125, %v690_v29  ;;  %v1538_v28 = vpack.c.bf16 %v1045_v27, %v1044_v26 }
 0x146   : > { %v694_v31 = vadd.f32 1e-05, %v692_v30 }
 0x148   : > { %1573 = vrsqrt.f32 %v694_v31 }
 0x14e   : > { %v1572_v32 = vpop.eup %1571 }
 0x14f   : > { %v697_v34 = vmul.f32 %v1572_v32, %v681_v9  ;;  %v1033_v9 = vld [vmem:[%s1756_s22 + $0x8] sm:$0xff] }
 0x150   : > { %v1514_v11 = vpack.c.bf16 %v1033_v9, %v1032_v8  ;;  %v1168_v9 = vand.u32 (!%p1377_p6), 127, %v1159_v5 }
 0x151   : > { %v705_v36 = vmul.f32 %v1364_v33, %v697_v34 }
 0x152   : > { %v1574_v37 = vpop.eup %1573  ;;  %1515 = vmatprep.subr.bf16.mxu1 %v1514_v11 }
 0x153   : > { %v698_v38 = vmul.f32 %v1574_v37, %v682_v13  ;;  %v713_v39 = vadd.f32 %v1365_v35, %v705_v36  ;;  %v1518_v13 = vpack.c.bf16 %v1035_v12, %v1034_v10  ;;  %1517 = vmatpush3.bf16.msra.mxu1 %v1514_v11  ;;  %v1371_v36 = vld [vmem:[%s1921_s24] ss:$0 sm:$0xff]  ;;  %v1173_v11 = vadd.s32 (!%p1377_p6), 4294967288, %v1168_v9 }
 0x155   : > { %v706_v42 = vmul.f32 %v1364_v33, %v698_v38  ;;  %1430 = vmatprep.mubr.msk.f32.mxu0 %vm671_vm1, %v713_v39  ;;  %1519 = vmatprep.subr.bf16.mxu1 %v1518_v13  ;;  %v1176_v15 = vsub.s32 (!%p1377_p6), %v1173_v11, %v1160_v6 }
 0x157   : > { %v714_v43 = vadd.f32 %v1365_v35, %v706_v42  ;;  %1521 = vmatpush3.bf16.msra.mxu1 %v1518_v13  ;;  %v1171_v13 = vsub.s32 (!%p1377_p6), %v1168_v9, %v1160_v6 }
 0x158   : > { %1523 = vmatprep.subr.bf16.mxu1 %v1522_v16 }
 0x159   : > { %1431 = vmatmul.mubr.msk.f32.vlgmr.msra.gmra.mrb[0].mxu0 %vm671_vm1, %v714_v43 }
 0x15a   : > { %1501 = vmatpush3.bf16.msra.mxu0 %v1498_v25  ;;  %v1534_v25 = vpack.c.bf16 %v1043_v24, %v1042_v23 }
 0x15b   : > { %1503 = vmatprep.subr.bf16.mxu0 %v1502_v44  ;;  %1525 = vmatpush3.bf16.msra.mxu1 %v1522_v16 }
 0x15c   : > { %1527 = vmatprep.subr.bf16.mxu1 %v1526_v19 }
 0x15e   : > { %1505 = vmatpush3.bf16.msra.mxu0 %v1502_v44 }
 0x15f   : > { %1529 = vmatpush3.bf16.msra.mxu1 %v1526_v19 }
 0x160   : > { %1531 = vmatprep.subr.bf16.mxu1 %v1530_v22 }
 0x163   : > { %1533 = vmatpush3.bf16.msra.mxu1 %v1530_v22 }
 0x164   : > { %1535 = vmatprep.subr.bf16.mxu1 %v1534_v25 }
 0x167   : > { %1537 = vmatpush3.bf16.msra.mxu1 %v1534_v25 }
 0x168   : > { %1539 = vmatprep.subr.bf16.mxu1 %v1538_v28 }
 0x16b   : > { %1541 = vmatpush3.bf16.msra.mxu1 %v1538_v28 }
 0x22c   : > { %v1432_v45 = vpop.f32.mrb[0].mxu0 }
 0x22d   : > { %v791_v46 = vpop.f32.mrb[1].mxu0 }
 0x22e   : > { %1441 = vmatprep.mubr.msk.f32.mxu0 %vm671_vm1, %v791_v46  ;;  %v1047_v46 = vld [vmem:[%s1756_s22 + $0x78] sm:$0xff] }
 0x22f   : > { %1442 = vmatmul.mubr.msk.f32.vlgmr.msra.gmra.mrb[2].mxu0 %vm671_vm1, %v1432_v45  ;;  %v1046_v45 = vld [vmem:[%s1756_s22 + $0x70] sm:$0xff] }
 0x302   : > { %v1443_v48 = vpop.f32.mrb[2].mxu0 }
 0x303   : > { %v889_v49 = vadd.f32 %v1443_v48, %v1368_v47  ;;  %v883_v50 = vpop.f32.mrb[3].mxu0  ;;  %v1373_v48 = vld [vmem:[%s646_s3] ss:$0 sm:$0xff] }
 0x304   : > { %v884_v51 = vadd.f32 %v1368_v47, %v883_v50  ;;  %v1542_v47 = vpack.c.bf16 %v1047_v46, %v1046_v45 }
 0x305   : > { %v1805_v52 = vadd.f32 %v889_v49, %v1767_v4 }
 0x306   : > { %v1808_v53 = vadd.f32 %v884_v51, %v1765_v3  ;;  %v939_v3 = vld [vmem:[%s1742_s28 + $0x8] sm:$0xff]  ;;  %1543 = vmatprep.subr.bf16.mxu1 %v1542_v47 }
 0x307   : > { %v899_v54 = vsel %vm671_vm1, %v1805_v52, 0.0  ;;  %v1506_v4 = vpack.c.bf16 %v939_v3, %v938_v2  ;;  %1545 = vmatpush3.bf16.msra.mxu1 %v1542_v47 }
 0x308   : > { %900 = vadd.xlane.f32.xlu1 %v899_v54  ;;  %v896_v55 = vsel %vm671_vm1, %v1808_v53, 0.0 }
 0x309   : > { %897 = vadd.xlane.f32.xlu0 %v896_v55  ;;  %1507 = vmatprep.subr.bf16.mxu0 %v1506_v4 }
 0x30a   : > { %1509 = vmatpush3.bf16.msra.mxu0 %v1506_v4  ;;  %v1605_v4 = vmov (!%p1377_p6), 0  }
 0x30b   : > { %1511 = vmatprep.subr.bf16.mxu0 %v1510_v7  ;;  %1579 = vset.pattern.permute.xlu1 (!%p1377_p6), %v1605_v4 }
 0x30c   : > { %1580 = vset.pattern.permute.xlu0 (!%p1377_p6), %v1605_v4 }
 0x30e   : > { %1513 = vmatpush3.bf16.msra.mxu0 %v1510_v7  ;;  %v1161_v7 = vsub.s32 (!%p1377_p6), 0, %v1160_v6 }
 0x395   : > { %v901_v56 = vpop.xlane.xlu1 %900 }
 0x396   : > { %v903_v57 = vmul.f32 0.03125, %v901_v56  ;;  %v898_v58 = vpop.xlane.xlu0 %897 }
 0x397   : > { %v902_v59 = vmul.f32 0.03125, %v898_v58 }
 0x398   : > { %v1815_v60 = vsub.f32 %v1805_v52, %v903_v57  ;;  %v1376_v57 = vld [vmem:[%s654_s12] ss:$0 sm:$0xff] }
 0x399   : > { %v1818_v61 = vsub.f32 %v1808_v53, %v902_v59 }
 0x39a   : > { %v907_v62 = vmul.f32 %v1815_v60, %v1815_v60 }
 0x39b   : > { %v906_v63 = vmul.f32 %v1818_v61, %v1818_v61 }
 0x39c   : > { %v911_v0 = vsel %vm671_vm1, %v907_v62, 0.0 }
 0x39d   : > { %912 = vadd.xlane.f32.xlu1 %v911_v0  ;;  %v908_v1 = vsel %vm671_vm1, %v906_v63, 0.0  ;;  %v1378_v0 = vld [vmem:[%s1922_s27] ss:$0 sm:$0xff] (!%p1377_p6) }
 0x39e   : > { %909 = vadd.xlane.f32.xlu0 %v908_v1  ;;  %v1153_v1 = vld [vmem:[#allocation3] sm:$0x1] (!%p1377_p6) }
 0x3ae   : > { %1156 = vperm.xlu1 (!%p1377_p6), %1579, %v1153_v1  }
 0x42a   : > { %v913_v29 = vpop.xlane.xlu1 %912 }
 0x42b   : > { %v915_v30 = vmul.f32 0.03125, %v913_v29  ;;  %v910_v31 = vpop.xlane.xlu0 %909 }
 0x42c   : > { %v914_v32 = vmul.f32 0.03125, %v910_v31 }
 0x42d   : > { %v917_v33 = vadd.f32 1e-05, %v915_v30 }
 0x42e   : > { %v916_v34 = vadd.f32 1e-05, %v914_v32  ;;  %v1157_v8 = vpop.permute.xlu1 (!%p1377_p6), %1156 }
 0x42f   : > { %1575 = vrsqrt.f32 %v917_v33  ;;  %v1162_v10 = vrot.slane (!%p1377_p6), %v1157_v8, %v1161_v7 }
 0x430   : > { %1577 = vrsqrt.f32 %v916_v34 }
 0x439   : > { %v1576_v35 = vpop.eup %1575 }
 0x43a   : > { %v1578_v37 = vpop.eup %1577  ;;  %v921_v38 = vmul.f32 %v1576_v35, %v1815_v60 }
 0x43b   : > { %v920_v39 = vmul.f32 %v1578_v37, %v1818_v61 }
 0x43c   : > { %v929_v41 = vmul.f32 %v1371_v36, %v921_v38 }
 0x43d   : > { %v928_v42 = vmul.f32 %v1371_v36, %v920_v39 }
 0x43e   : > { %v937_v44 = vadd.f32 %v1372_v40, %v929_v41 }
 0x43f   : > { %v936_v43 = vadd.f32 %v1372_v40, %v928_v42 }
 0x441   : > { %1452 = vmatprep.mubr.msk.f32.mxu0 %vm671_vm1, %v936_v43 }
 0x442   : > { %1453 = vmatmul.mubr.msk.f32.vlgmr.msra.gmra.mrb[4].mxu0 %vm671_vm1, %v937_v44 }
 0x515   : > { %v1454_v49 = vpop.f32.mrb[4].mxu0 }
 0x516   : > { %v1027_v50 = vadd.f32 %v1454_v49, %v1373_v48  ;;  %v1021_v51 = vpop.f32.mrb[5].mxu0 }
 0x517   : > { %v1022_v54 = vadd.f32 %v1373_v48, %v1021_v51 }
 0x518   : > { %v1031_v56 = vmax.f32 %v1027_v50, 0.0 }
 0x519   : > { %v1030_v55 = vmax.f32 %v1022_v54, 0.0 }
 0x51b   : > { %1487 = vmatprep.mubr.f32.mxu1 %v1030_v55 }
 0x51c   : > { %1488 = vmatmul.mubr.f32.vlgmr.msra.gmra.mrb[0].mxu1 %v1031_v56 }
 0x5ef   : > { %v1489_v58 = vpop.f32.mrb[0].mxu1  ;;  %1137 = sbr.rel (%p1377_p6) target bundleno = 1680 (0x690), region = 84 }
 0x5f0   : > { %v1127_v59 = vadd.f32 %v1489_v58, %v1376_v57  ;;  %v1121_v60 = vpop.f32.mrb[1].mxu1 }
 0x5f1   : > { %v1122_v61 = vadd.f32 %v1376_v57, %v1121_v60 }
 0x5f2   : > { %v1131_v62 = vadd.f32 %v1127_v59, %v1805_v52 }
 0x5f3   : > { %v1130_v63 = vadd.f32 %v1122_v61, %v1808_v53 }
 0x5f4   : > { %1133 = vst.msk [vmem:[#allocation2 + $0x8] sm:$0xff] %vm671_vm1, %v1131_v62  ;;  %v1146_v3 = vmul.f32 (!%p1377_p6), %v1378_v0, %v1131_v62 }
 0x5f5   : > { %1132 = vst.msk [vmem:[#allocation2] sm:$0xff] %vm671_vm1, %v1130_v63  ;;  %v1145_v2 = vmul.f32 (!%p1377_p6), %v1378_v0, %v1130_v63 }
 0x5f6   : > { %v1150_v53 = vsel %vm671_vm1, %v1146_v3, 0.0 }
 0x5f7   : > { %v1147_v52 = vsel %vm671_vm1, %v1145_v2, 0.0 }
 0x5f8   : > { %1148 = vadd.xlane.f32.xlu0 %v1147_v52 }
 0x5fc   : > { %1151 = vadd.xlane.f32.xlu0 %v1150_v53 }
 0x685   : > { %v1149_v12 = vpop.xlane.xlu0 %1148 }
 0x686   : > { %v1163_v14 = vadd.f32 %v1162_v10, %v1149_v12 }
 0x688   : > { %v1172_v18 = vrot.slane %v1163_v14, %v1171_v13 }
 0x689   : > { %v1152_v16 = vpop.xlane.xlu0 %1151 }
 0x68a   : > { %v1164_v17 = vadd.f32 %v1162_v10, %v1152_v16 }
 0x68c   : > { %v1177_v19 = vrot.slane %v1164_v17, %v1176_v15 }
 0x68e   : > { %v1179_v20 = vsel %vm1178_vm2, %v1177_v19, %v1172_v18 }
 0x68f   : > { %1182 = vst.msk [vmem:[%s1923_s18] sm:$0x1] %vm1181_vm3, %v1179_v20 }
 0x690 PF: > { %s1924_s29 = sld [smem:[#allocation5_spill]]  ;;  %s1925_s15 = sld [smem:[#allocation4_spill]] }
 0x691   : > { %s1926_s16 = sld [smem:[#allocation6_spill]] }
 0x696   : > { %s26_s17 = sadd.s32 1, %s1924_s29  }
 0x697   : > { %p23_p7 = scmp.ge.s32.totalorder %s26_s17, 4  }
 0x699   :  { %25 = sbr.rel (!%p23_p7) target bundleno = 5 (0x5), region = 147 }

</bundles_post_ra>
